<compile_context>
chip_gen: v5e
topology: v5e:2x2
jax: 0.10.0
libtpu: 0.0.40
codegen_flags: <defaults>
</compile_context>

<pallas_src>
import functools

import jax
import jax.numpy as jnp
from jax.experimental import pallas as pl
from jax.experimental.pallas import tpu as pltpu


def _ce_kernel(logits_ref, labels_ref, out_ref, *, ignore_index, hw):
    """Per-tile cross-entropy with lane-parallel accumulation into out_ref.

    logits_ref: (1, C, TILE_P) VMEM tile (classes on sublanes, pixels on lanes)
    labels_ref: (1, 1, TILE_P) integer VMEM tile
    out_ref:    (1, 1, TILE_P) f32 per-(image, split) partial sums; the same
                output block is revisited across the reduction axis, so it is
                VMEM-resident and used directly as the accumulator.
    """
    s = pl.program_id(1)               # split index (parallel)
    p = pl.program_id(2)               # pixel-tile index within split (reduction)
    p_inner = pl.num_programs(2)

    @pl.when(p == 0)
    def _():
        out_ref[...] = jnp.zeros_like(out_ref)

    x = logits_ref[0].astype(jnp.float32)       # (C, TILE_P)
    lbl = labels_ref[0].astype(jnp.int32)       # (1, TILE_P)
    num_classes = x.shape[0]
    tile_p = x.shape[1]

    # Numerically stable log-sum-exp over the short class (sublane) axis.
    m = jnp.max(x, axis=0, keepdims=True)                        # (1, TILE_P)
    e = jnp.exp(x - m)                                           # (C, TILE_P)
    lse = m + jnp.log(jnp.sum(e, axis=0, keepdims=True))         # (1, TILE_P)

    # logits[label] via a statically-unrolled select over the small class axis
    # (no block-sized iota / mask intermediates).
    picked = jnp.zeros((1, tile_p), jnp.float32)
    for c in range(num_classes):
        picked = picked + jnp.where(lbl == c, x[c:c + 1, :], 0.0)

    # Mask: ignore_index / out-of-range labels, and lanes of the last partial
    # tile that fall beyond the image (those lanes hold padded/garbage data).
    tile_idx = s * p_inner + p
    lane = jax.lax.broadcasted_iota(jnp.int32, (1, tile_p), 1)
    pix = tile_idx * tile_p + lane
    valid = (pix < hw) & (lbl >= 0) & (lbl != ignore_index) & (lbl < num_classes)

    out_ref[0, :, :] += jnp.where(valid, lse - picked, 0.0)


def cross_entropy_loss(pred, label, *, loss_weight=1.0, ignore_index=255,
                       num_splits=1, tile_p=None):
    """Forward of CrossEntropyLoss (use_sigmoid=False, reduction='mean').

    pred:  (N, C, H, W) logits (NCHW, same as the PyTorch module); f32 or bf16.
    label: (N, H, W)    integer class indices in [0, C) or == ignore_index;
                        int32 / uint8 / etc. (cast to int32 inside the kernel).
    returns: scalar float32 loss
    """
    # TODO(synk): class_weight / per-sample weight / avg_factor / use_sigmoid /
    # reduction_override paths are not exercised by the default module config
    # and are not implemented.
    N, C, H, W = pred.shape
    HW = H * W

    # Free reshapes only (no transpose, no dtype conversion): pixels on lanes,
    # classes on sublanes; native dtypes go over HBM, casts happen in VMEM.
    logits = pred.reshape(N, C, HW)
    labels = label.reshape(N, 1, HW)

    # Generation-dependent VMEM budget.  Budget counts: 2x double-buffered
    # logits block + ~2 block-sized f32 temporaries (x-m, e) inside the kernel.
    try:
        vmem_cap = pltpu.get_tpu_info().vmem_capacity_bytes
    except Exception:  # pragma: no cover - conservative fallback
        vmem_cap = None
    if vmem_cap is not None and vmem_cap > 96 * 1024 * 1024:
        # v5e / v6e: 128 MiB physical VMEM.
        budget_bytes = 8 * 1024 * 1024
        vmem_limit = 64 * 1024 * 1024
    else:
        # v7x (64 MiB per TC) or unknown: stay conservative.
        budget_bytes = 4 * 1024 * 1024
        vmem_limit = 32 * 1024 * 1024

    # Pixel-tile size from the byte budget (f32 working width), multiple of 128
    # lanes; full-extent block if the image is smaller than one tile.
    if tile_p is None:
        tp = max(128, (budget_bytes // (4 * C)) // 128 * 128)
    else:
        tp = int(tile_p)
    TILE_P = HW if tp >= HW else tp
    P_tiles = pl.cdiv(HW, TILE_P)

    # Megacore split over pixel tiles (useful on v7x only, and only when N
    # alone cannot load-balance both cores).  Only applied if it divides evenly
    # so the index maps stay trivial.
    num_splits = max(1, int(num_splits))
    SPLIT = num_splits if (P_tiles % num_splits == 0) else 1
    P_inner = P_tiles // SPLIT

    kernel = functools.partial(_ce_kernel, ignore_index=ignore_index, hw=HW)

    out_bytes = N * SPLIT * TILE_P * 4
    cost = pl.CostEstimate(
        flops=6 * N * C * HW,
        transcendentals=N * (C + 1) * HW,
        bytes_accessed=(logits.size * logits.dtype.itemsize
                        + labels.size * labels.dtype.itemsize
                        + out_bytes),
    )

    partials = pl.pallas_call(
        kernel,
        out_shape=jax.ShapeDtypeStruct((N * SPLIT, 1, TILE_P), jnp.float32),
        grid_spec=pltpu.PrefetchScalarGridSpec(
            num_scalar_prefetch=0,
            grid=(N, SPLIT, P_inner),
            in_specs=[
                pl.BlockSpec((1, C, TILE_P),
                             lambda n, s, p: (n, 0, s * P_inner + p)),
                pl.BlockSpec((1, 1, TILE_P),
                             lambda n, s, p: (n, 0, s * P_inner + p)),
            ],
            out_specs=pl.BlockSpec((1, 1, TILE_P),
                                   lambda n, s, p: (n * SPLIT + s, 0, 0)),
        ),
        compiler_params=pltpu.CompilerParams(
            dimension_semantics=("parallel", "parallel", "arbitrary"),
            vmem_limit_bytes=vmem_limit),
        cost_estimate=cost,
    )(logits, labels)

    # reduction='mean' in weight_reduce_loss = mean over ALL pixels (ignored
    # pixels contribute 0 to the sum but ARE counted in the denominator).
    loss_sum = jnp.sum(partials)
    return (jnp.float32(loss_weight) * loss_sum / (N * HW)).astype(jnp.float32)


def _reference(pred, label, *, ignore_index=255, loss_weight=1.0):
    """Pure-JAX reference matching the PyTorch module semantics."""
    N, C, H, W = pred.shape
    logits = jnp.transpose(pred, (0, 2, 3, 1)).reshape(-1, C).astype(jnp.float32)
    labels = label.reshape(-1).astype(jnp.int32)
    lse = jax.scipy.special.logsumexp(logits, axis=-1)
    safe = jnp.clip(labels, 0, C - 1)
    picked = jnp.take_along_axis(logits, safe[:, None], axis=-1)[:, 0]
    valid = (labels >= 0) & (labels != ignore_index) & (labels < C)
    loss = jnp.where(valid, lse - picked, 0.0)
    return loss_weight * jnp.mean(loss)


if __name__ == "__main__":
    key = jax.random.PRNGKey(0)
    k1, k2, k3, k4, k5 = jax.random.split(key, 5)

    # --- Main check: small NCHW f32 logits, int32 labels with ignore pixels ---
    N, C, H, W = 2, 4, 16, 16
    pred = jax.random.normal(k1, (N, C, H, W), dtype=jnp.float32)
    label = jax.random.randint(k2, (N, H, W), 0, C, dtype=jnp.int32)
    ignore_mask = jax.random.bernoulli(k3, 0.1, (N, H, W))
    label = jnp.where(ignore_mask, jnp.int32(255), label)

    out = cross_entropy_loss(pred, label, loss_weight=1.0, ignore_index=255)
    out = jax.block_until_ready(out)
    ref = _reference(pred, label, ignore_index=255, loss_weight=1.0)
    assert jnp.allclose(out, ref, atol=1e-5, rtol=1e-5), (out, ref)

    # --- Partial-tile check: HW not a multiple of the tile (lane masking) ---
    H2 = W2 = 13   # HW = 169, tile_p=128 -> last block is padded and masked
    pred2 = jax.random.normal(k4, (N, C, H2, W2), dtype=jnp.float32)
    label2 = jax.random.randint(k5, (N, H2, W2), 0, C, dtype=jnp.int32)
    label2 = jnp.where(label2 == 0, jnp.int32(255), label2)  # some ignored px

    out2 = cross_entropy_loss(pred2, label2, loss_weight=1.0, ignore_index=255,
                              tile_p=128)
    out2 = jax.block_until_ready(out2)
    ref2 = _reference(pred2, label2, ignore_index=255, loss_weight=1.0)
    assert jnp.allclose(out2, ref2, atol=1e-5, rtol=1e-5), (out2, ref2)

    # --- Native narrow dtypes: bf16 logits + uint8 labels straight to HBM ---
    pred_bf16 = pred.astype(jnp.bfloat16)
    label_u8 = label.astype(jnp.uint8)   # 255 == ignore_index still fits
    out3 = cross_entropy_loss(pred_bf16, label_u8, loss_weight=1.0,
                              ignore_index=255)
    out3 = jax.block_until_ready(out3)
    ref3 = _reference(pred_bf16, label, ignore_index=255, loss_weight=1.0)
    assert jnp.allclose(out3, ref3, atol=1e-4, rtol=1e-4), (out3, ref3)

    print("KERNEL_OK")
</pallas_src>

<mosaic_0001>
module attributes {stable_mosaic.version = 11 : i64} {
  func.func @_ce_kernel(%arg0: i32, %arg1: i32, %arg2: i32, %arg3: memref<1x4x256xf32, #tpu.memory_space<vmem>>, %arg4: memref<1x1x256xi32, #tpu.memory_space<vmem>>, %arg5: memref<1x1x256xf32, #tpu.memory_space<vmem>>) attributes {dimension_semantics = [#tpu.dimension_semantics<parallel>, #tpu.dimension_semantics<parallel>, #tpu.dimension_semantics<arbitrary>], iteration_bounds = array<i64: 2, 1, 1>, scalar_prefetch = 0 : i64, scratch_operands = 0 : i64, tpu.core_type = #tpu.core_type<tc>, window_params = [{transform_indices = @transform_0, window_bounds = array<i64: 1, 4, 256>}, {transform_indices = @transform_1, window_bounds = array<i64: 1, 1, 256>}, {transform_indices = @transform_2, window_bounds = array<i64: 1, 1, 256>}]} {
    %c0_i32 = arith.constant 0 : i32
    %0 = arith.cmpi eq, %arg2, %c0_i32 : i32
    %1 = arith.extui %0 : i1 to i32
    %c0_i32_0 = arith.constant 0 : i32
    %2 = arith.cmpi ne, %1, %c0_i32_0 : i32
    scf.if %2 {
      %cst_23 = arith.constant 0.000000e+00 : f32
      %67 = vector.broadcast %cst_23 : f32 to vector<1x1x256xf32>
      %c0_24 = arith.constant 0 : index
      %c0_25 = arith.constant 0 : index
      %c0_26 = arith.constant 0 : index
      %68 = vector.load %arg5[%c0_24, %c0_25, %c0_26] : memref<1x1x256xf32, #tpu.memory_space<vmem>>, vector<1x1x256xf32>
      tpu.vector_store %arg5[%c0_24, %c0_25, %c0_26], %67 {strides = array<i32>} : memref<1x1x256xf32, #tpu.memory_space<vmem>>, vector<1x1x256xf32>,
    } else {
    }
    %c0 = arith.constant 0 : index
    %c0_1 = arith.constant 0 : index
    %c0_2 = arith.constant 0 : index
    %3 = vector.load %arg3[%c0, %c0_1, %c0_2] : memref<1x4x256xf32, #tpu.memory_space<vmem>>, vector<1x4x256xf32>
    %4 = vector.shape_cast %3 : vector<1x4x256xf32> to vector<4x256xf32>
    %c0_3 = arith.constant 0 : index
    %c0_4 = arith.constant 0 : index
    %c0_5 = arith.constant 0 : index
    %5 = vector.load %arg4[%c0_3, %c0_4, %c0_5] : memref<1x1x256xi32, #tpu.memory_space<vmem>>, vector<1x1x256xi32>
    %6 = vector.shape_cast %5 : vector<1x1x256xi32> to vector<1x256xi32>
    %cst = arith.constant dense<0xFF800000> : vector<256xf32>
    %7 = vector.multi_reduction <maximumf>, %4, %cst [0] : vector<4x256xf32> to vector<256xf32>
    %8 = vector.shape_cast %7 : vector<256xf32> to vector<1x256xf32>
    %9 = vector.broadcast %8 : vector<1x256xf32> to vector<4x256xf32>
    %10 = arith.subf %4, %9 : vector<4x256xf32>
    %11 = math.exp %10 : vector<4x256xf32>
    %cst_6 = arith.constant dense<0.000000e+00> : vector<256xf32>
    %12 = vector.multi_reduction <add>, %11, %cst_6 [0] : vector<4x256xf32> to vector<256xf32>
    %13 = vector.shape_cast %12 : vector<256xf32> to vector<1x256xf32>
    %14 = math.log %13 : vector<1x256xf32>
    %15 = arith.addf %8, %14 : vector<1x256xf32>
    %cst_7 = arith.constant 0.000000e+00 : f32
    %16 = vector.broadcast %cst_7 : f32 to vector<1x256xf32>
    %c0_i32_8 = arith.constant 0 : i32
    %17 = vector.broadcast %c0_i32_8 : i32 to vector<1x256xi32>
    %18 = arith.cmpi eq, %6, %17 : vector<1x256xi32>
    %19 = vector.extract_strided_slice %4 {offsets = [0, 0], sizes = [1, 256], strides = [1, 1]} : vector<4x256xf32> to vector<1x256xf32>
    %cst_9 = arith.constant 0.000000e+00 : f32
    %20 = vector.broadcast %cst_9 : f32 to vector<1x256xf32>
    %21 = arith.select %18, %19, %20 : vector<1x256xi1>, vector<1x256xf32>
    %22 = arith.addf %16, %21 : vector<1x256xf32>
    %c1_i32 = arith.constant 1 : i32
    %23 = vector.broadcast %c1_i32 : i32 to vector<1x256xi32>
    %24 = arith.cmpi eq, %6, %23 : vector<1x256xi32>
    %25 = vector.extract_strided_slice %4 {offsets = [1, 0], sizes = [1, 256], strides = [1, 1]} : vector<4x256xf32> to vector<1x256xf32>
    %cst_10 = arith.constant 0.000000e+00 : f32
    %26 = vector.broadcast %cst_10 : f32 to vector<1x256xf32>
    %27 = arith.select %24, %25, %26 : vector<1x256xi1>, vector<1x256xf32>
    %28 = arith.addf %22, %27 : vector<1x256xf32>
    %c2_i32 = arith.constant 2 : i32
    %29 = vector.broadcast %c2_i32 : i32 to vector<1x256xi32>
    %30 = arith.cmpi eq, %6, %29 : vector<1x256xi32>
    %31 = vector.extract_strided_slice %4 {offsets = [2, 0], sizes = [1, 256], strides = [1, 1]} : vector<4x256xf32> to vector<1x256xf32>
    %cst_11 = arith.constant 0.000000e+00 : f32
    %32 = vector.broadcast %cst_11 : f32 to vector<1x256xf32>
    %33 = arith.select %30, %31, %32 : vector<1x256xi1>, vector<1x256xf32>
    %34 = arith.addf %28, %33 : vector<1x256xf32>
    %c3_i32 = arith.constant 3 : i32
    %35 = vector.broadcast %c3_i32 : i32 to vector<1x256xi32>
    %36 = arith.cmpi eq, %6, %35 : vector<1x256xi32>
    %37 = vector.extract_strided_slice %4 {offsets = [3, 0], sizes = [1, 256], strides = [1, 1]} : vector<4x256xf32> to vector<1x256xf32>
    %cst_12 = arith.constant 0.000000e+00 : f32
    %38 = vector.broadcast %cst_12 : f32 to vector<1x256xf32>
    %39 = arith.select %36, %37, %38 : vector<1x256xi1>, vector<1x256xf32>
    %40 = arith.addf %34, %39 : vector<1x256xf32>
    %c1_i32_13 = arith.constant 1 : i32
    %41 = arith.muli %arg1, %c1_i32_13 : i32
    %42 = arith.addi %41, %arg2 : i32
    %43 = tpu.iota {dimensions = array<i32: 1>} : vector<1x256xi32>
    %c256_i32 = arith.constant 256 : i32
    %44 = arith.muli %42, %c256_i32 : i32
    %45 = vector.broadcast %44 : i32 to vector<1x256xi32>
    %46 = arith.addi %45, %43 : vector<1x256xi32>
    %c256_i32_14 = arith.constant 256 : i32
    %47 = vector.broadcast %c256_i32_14 : i32 to vector<1x256xi32>
    %48 = arith.cmpi slt, %46, %47 : vector<1x256xi32>
    %c0_i32_15 = arith.constant 0 : i32
    %49 = vector.broadcast %c0_i32_15 : i32 to vector<1x256xi32>
    %50 = arith.cmpi sge, %6, %49 : vector<1x256xi32>
    %51 = arith.andi %48, %50 : vector<1x256xi1>
    %c255_i32 = arith.constant 255 : i32
    %52 = vector.broadcast %c255_i32 : i32 to vector<1x256xi32>
    %53 = arith.cmpi ne, %6, %52 : vector<1x256xi32>
    %54 = arith.andi %51, %53 : vector<1x256xi1>
    %c4_i32 = arith.constant 4 : i32
    %55 = vector.broadcast %c4_i32 : i32 to vector<1x256xi32>
    %56 = arith.cmpi slt, %6, %55 : vector<1x256xi32>
    %57 = arith.andi %54, %56 : vector<1x256xi1>
    %c0_16 = arith.constant 0 : index
    %c0_17 = arith.constant 0 : index
    %c0_18 = arith.constant 0 : index
    %58 = vector.load %arg5[%c0_16, %c0_17, %c0_18] : memref<1x1x256xf32, #tpu.memory_space<vmem>>, vector<1x1x256xf32>
    %59 = vector.shape_cast %58 : vector<1x1x256xf32> to vector<1x256xf32>
    %60 = arith.subf %15, %40 : vector<1x256xf32>
    %cst_19 = arith.constant 0.000000e+00 : f32
    %61 = vector.broadcast %cst_19 : f32 to vector<1x256xf32>
    %62 = arith.select %57, %60, %61 : vector<1x256xi1>, vector<1x256xf32>
    %63 = arith.addf %59, %62 : vector<1x256xf32>
    %c0_20 = arith.constant 0 : index
    %c0_21 = arith.constant 0 : index
    %c0_22 = arith.constant 0 : index
    %64 = vector.load %arg5[%c0_20, %c0_21, %c0_22] : memref<1x1x256xf32, #tpu.memory_space<vmem>>, vector<1x1x256xf32>
    %65 = vector.shape_cast %64 : vector<1x1x256xf32> to vector<1x256xf32>
    %66 = vector.shape_cast %63 : vector<1x256xf32> to vector<1x1x256xf32>
    tpu.vector_store %arg5[%c0_20, %c0_21, %c0_22], %66 {strides = array<i32>} : memref<1x1x256xf32, #tpu.memory_space<vmem>>, vector<1x1x256xf32>,
    return
  }
  func.func @transform_0(%arg0: i32, %arg1: i32, %arg2: i32) -> (i32, i32, i32) {
    %c1_i32 = arith.constant 1 : i32
    %0 = arith.muli %arg1, %c1_i32 : i32
    %1 = arith.addi %0, %arg2 : i32
    %c0_i32 = arith.constant 0 : i32
    %c0_i32_0 = arith.constant 0 : i32
    return %arg0, %c0_i32, %1 : i32, i32, i32
  }
  func.func @transform_1(%arg0: i32, %arg1: i32, %arg2: i32) -> (i32, i32, i32) {
    %c1_i32 = arith.constant 1 : i32
    %0 = arith.muli %arg1, %c1_i32 : i32
    %1 = arith.addi %0, %arg2 : i32
    %c0_i32 = arith.constant 0 : i32
    %c0_i32_0 = arith.constant 0 : i32
    return %arg0, %c0_i32, %1 : i32, i32, i32
  }
  func.func @transform_2(%arg0: i32, %arg1: i32, %arg2: i32) -> (i32, i32, i32) {
    %c1_i32 = arith.constant 1 : i32
    %0 = arith.muli %arg0, %c1_i32 : i32
    %1 = arith.addi %0, %arg1 : i32
    %c0_i32 = arith.constant 0 : i32
    %c0_i32_0 = arith.constant 0 : i32
    %c0_i32_1 = arith.constant 0 : i32
    return %1, %c0_i32, %c0_i32_0 : i32, i32, i32
  }
}

</mosaic_0001>

<bundles_post_ra>
// kernel: tpu_custom_call.1
= control target key start
LH: loop header
LB: loop body
LE: loop exit
PB: predicated region body
PF: predicated region fallthrough
CT: control target
= control target key end

     0   :  { %7 = vsyncpa [#allocation3], 0  ;;  %s984_s0 = inlined_call_operand.hbm [shape: f32[2,4,256], index: 0, kind: input, shape index: {}]   ;;  %s985_s1 = inlined_call_operand.hbm [shape: s32[2,1,256], index: 1, kind: input, shape index: {}]   ;;  %s986_s2 = inlined_call_operand.hbm [shape: f32[2,1,256], index: 2, kind: output, shape index: {}]  }
   0x1   :  { %9 = vsyncpa [#allocation3 + $0x1], 0 }
   0x2   :  { %10 = vsyncpa [#allocation6], 0 }
   0x3   :  { %12 = vsyncpa [#allocation6 + $0x1], 0 }
   0x4   :  { %13 = vsyncpa [#allocation4], 0 }
   0x5   :  { %15 = vsyncpa [#allocation4 + $0x1], 0  ;;  %s777_s9 = smov 0   ;;  %s779_s10 = smov 0  }
   0x6   :  { %s781_s11 = smov 0   ;;  %s783_s12 = smov 0  }
   0x7   :  { %s785_s13 = smov 0   ;;  %s787_s14 = smov 0  }
   0x8 LB: > { %s519_s15 = sadd.s32 4294967295, %s758_s14   ;;  %s520_s16 = sadd.s32 4294967294, %s758_s14   ;;  %s758_s14 = sphi %s787_s14, %s21_s14   ;;  %s754_s13 = sphi %s785_s13, %s1006_s13   ;;  %s750_s12 = sphi %s783_s12, %s1005_s12   ;;  %s746_s11 = sphi %s781_s11, %s1004_s11   ;;  %s742_s10 = sphi %s779_s10, %s1003_s10   ;;  %s738_s9 = sphi %s777_s9, %s1002_s9  }
   0x9   : > { %s40_s17 = sadd.s32 1, %s754_s13  ;;  %s51_s18 = sadd.s32 1, %s746_s11 }
   0xa   : > { %p42_p0 = scmp.ge.s32.totalorder %s40_s17, 2  ;;  %p58_p1 = scmp.ne.s32.totalorder %s746_s11, %s742_s10 }
   0xb   : > { %p59_p2 = scmp.eq.s32.totalorder %s758_s14, 0  ;;  %p64_p3 = scmp.ne.s32.totalorder %s742_s10, %s738_s9 }
   0xc   : > { %s1008_s17 = smov (%p42_p0, %s40_s17), 0  ;;  %p65_p5 = scmp.eq.s32.totalorder %s519_s15, 0 }
   0xd   : > { %p818_p4 = por %p59_p2, %p58_p1  ;;  %s46_s20 = ssub.s32 %s754_s13, %s1008_s17 }
   0xe   : > { %p120_p6 = scmp.eq.s32.totalorder %s519_s15, 1  ;;  %p49_p7 = scmp.eq.s32.totalorder %s46_s20, 0 }
   0xf   : > { %p824_p8 = por %p65_p5, %p64_p3  ;;  %p126_p10 = scmp.eq.s32.totalorder %s520_s16, 1 }
  0x10   : > { %p828_p9 = por %p120_p6, %p58_p1  ;;  %p522_p12 = scmp.ge.s32.totalorder %s758_s14, 2 }
  0x11   : > { %s833_s23 = scalar_select %p49_p7, %s746_s11, %s51_s18  }
  0x12   : > { %p835_p11 = por %p126_p10, %p64_p3  ;;  %p554_p13 = scmp.lt.s32.totalorder %s758_s14, 2 }
  0x13   : > { %s146_s25 = sand.u32 1, %s746_s11   ;;  %s536_s27 = sshll.u32 %s754_s13, 3 }
  0x14   : > { %s523_s26 = sshll.u32 %s146_s25, 3  ;;  %s158_s30 = scalar_lea.hbm %s984_s0, %s536_s27 }
  0x15   : > { %s150_s3 = scalar_lea.vmem [#allocation2], %s523_s26  ;;  %s160_s5 = sshll.u32 %s158_s30, 4  ;;  %s161_s5 = int_to_ptr.hbm [resolvable:$true] %s160_s5 }
  0x16   : > { %s162_s4 = sshll.u32 %s150_s3, 4  ;;  %p848_p0 = pnand %p554_p13, %p818_p4  ;;  %s163_s4 = int_to_ptr.vmem [resolvable:$true] %s162_s4 }
  0x17   : > { %p528_p1 = scmp.ge.s32.totalorder %s758_s14, 1  ;;  %p189_p2 = scmp.lt.s32.totalorder %s758_s14, 3 }
  0x18   : > { %s147_s7 = scalar_lea.sflag [#allocation3], %s146_s25  ;;  %s526_s8 = sshll.u32 %s146_s25, 1 }
  0x19   : > { %546 = dma.hbm_to_vmem [thread:$0]  (!%p848_p0), %s161_s5, 128, %s163_s4, %s147_s7  }
  0x1a   : > { %p190_p3 = pnand %p528_p1, %p189_p2  ;;  %s527_s15 = sshll.u32 %s754_s13, 1 }
  0x1b   : > { %s180_s20 = scalar_lea.hbm %s985_s1, %s527_s15  ;;  %s173_s26 = scalar_lea.vmem [#allocation5], %s526_s8 }
  0x1c   : > { %s184_s19 = sshll.u32 %s173_s26, 4  ;;  %s182_s27 = sshll.u32 %s180_s20, 4  ;;  %s185_s19 = int_to_ptr.vmem [resolvable:$true] %s184_s19  ;;  %s183_s27 = int_to_ptr.hbm [resolvable:$true] %s182_s27 }
  0x1d   : > { %s170_s28 = scalar_lea.sflag [#allocation6], %s146_s25  ;;  %193 = sbr.rel (%p190_p3) target bundleno = 122 (0x7a), region = 28 }
  0x1e   : > { %549 = dma.hbm_to_vmem [thread:$0]  (!%p848_p0), %s183_s27, 32, %s185_s19, %s170_s28  }
  0x1f   : > { %s863_s29 = sand.u32 (!%p190_p3), 1, %s742_s10  }
  0x20   : > { %s529_s30 = sshll.u32 (!%p190_p3), %s863_s29, 3  ;;  %s196_s3 = scalar_lea.sflag (!%p190_p3), [#allocation3], %s863_s29 }
  0x21   : > { %s199_s4 = scalar_lea.vmem (!%p190_p3), [#allocation2], %s529_s30 }
  0x22   : > { %725 = dma.done.wait (%p824_p8), %s196_s3, 128  }
  0x23   : > { %727 = vsyncadd (%p824_p8), %s196_s3, 4294967168  ;;  %s530_s25 = sshll.u32 %s863_s29, 1  ;;  %s206_s5 = scalar_lea.sflag [#allocation6], %s863_s29 }
  0x24   : > { %s875_s6 = scalar_lea.vmem [#allocation5], %s530_s25 }
  0x25   : > { %729 = dma.done.wait (%p824_p8), %s206_s5, 32  }
  0x26   : > { %731 = vsyncadd (%p824_p8), %s206_s5, 4294967264  ;;  %v881_v0 = vld [vmem:[%s199_s4] sm:$0xff]  ;;  %vm258_vm0 = vcmask 1043456   ;;  %v245_v22 = vlaneseq  ;;  %s900_s21 = scalar_lea.vmem [#allocation7], %s530_s25  ;;  %v760_v24 = vmov 0.0   ;;  %vm309_vm2 = vcmask 1040384  }
  0x27   : > { %253 = vst [vmem:[#allocation1] ss:$2 sm:$0xff] %v881_v0  ;;  %v308_v40 = vrot.slane %v881_v0, 3  ;;  %v251_v43 = vld [vmem:[%s875_s6] sm:$0x3]  ;;  %v761_v46 = vmov 0  }
  0x28   : > { %vm894_vm1 = vcmp.lt.s32.totalorder %v245_v22, 256  ;;  %vm345_vm3 = vcmp.ge.s32.totalorder %v251_v43, 0  ;;  %vm353_vm4 = vcmp.ne.s32.totalorder %v251_v43, 255  ;;  %vm307_vm5 = vcmp.eq.s32.totalorder %v251_v43, 0  ;;  %s533_s7 = sshll.u32 %s750_s12, 1  ;;  %s404_s16 = sshll.u32 %s900_s21, 4  ;;  %s405_s16 = int_to_ptr.vmem [resolvable:$true] %s404_s16 }
  0x29   : > { %249 = vst.msk [vmem:[%s900_s21] sm:$0x3] %vm894_vm1, %v760_v24  ;;  %v310_v44 = vsel %vm309_vm2, %v881_v0, %v308_v40  ;;  %vm314_vm6 = vcmp.eq.s32.totalorder %v251_v43, 1  ;;  %v346_v47 = vsel %vm345_vm3, 1, %v761_v46  ;;  %v354_v48 = vsel %vm353_vm4, 1, %v761_v46  ;;  %s402_s12 = scalar_lea.hbm %s986_s2, %s533_s7  ;;  %s391_s20 = scalar_lea.sflag [#allocation4], %s863_s29 }
  0x2a   : > { %vm361_vm7 = vcmp.lt.s32.totalorder %v251_v43, 4  ;;  %v312_v49 = vsel %vm307_vm5, %v310_v44, 0.0  ;;  %vm321_vm8 = vcmp.eq.s32.totalorder %v251_v43, 2  ;;  %v348_v51 = vperm.slane %v346_v47, 1  ;;  %s406_s18 = sshll.u32 %s402_s12, 4  ;;  %s692_s30 = scalar_lea.hbm %s986_s2, 4  ;;  %s407_s18 = int_to_ptr.hbm [resolvable:$true] %s406_s18 }
  0x2b   : > { %v356_v52 = vperm.slane %v354_v48, 1  ;;  %v362_v53 = vsel %vm361_vm7, 1, %v761_v46  ;;  %v347_v57 = vperm.slane %v346_v47, 0  ;;  %v355_v58 = vperm.slane %v354_v48, 0  ;;  %s686_s26 = sshra.s32 %s407_s18, 4  ;;  %s687_s26 = int_to_ptr.hbm [resolvable:$true] %s686_s26 }
  0x2c   : > { %vm328_vm9 = vcmp.eq.s32.totalorder %v251_v43, 3  ;;  %v364_v60 = vperm.slane %v362_v53, 1  ;;  %vm914_vm10 = vcmp.ne.s32.totalorder %v348_v51, 0  ;;  %v363_v63 = vperm.slane %v362_v53, 0  ;;  %s688_s19 = scalar_lea.hbm %s687_s26, 2  ;;  %p693_p7 = scmp.lt.s32.totalorder %s687_s26, %s986_s2 }
  0x2d   : > { %vm918_vm11 = vcmp.ne.s32.totalorder %v356_v52, 0  ;;  %vm922_vm12 = vcmp.ne.s32.totalorder %v347_v57, 0  ;;  %vm926_vm13 = vcmp.ne.s32.totalorder %v355_v58, 0  ;;  %p689_p4 = scmp.ne.s32.totalorder %s687_s26, %s688_s19  ;;  %p694_p8 = scmp.lt.s32.totalorder %s692_s30, %s688_s19 }
  0x2e   : > { %v254_v1 = vld.sshfl [vmem:[#allocation1] sm:$0xff pattern:$0x75316420]  ;;  %v255_v2 = vld.sshfl [vmem:[#allocation1 + $0x8] sm:$0xff pattern:$0x75316420]  ;;  %vm360_vm14 = vmand %vm914_vm10, %vm918_vm11 }
  0x2f   : > { %v259_v3 = vsel %vm258_vm0, %v254_v1, -inf  ;;  %v266_v4 = vsel %vm258_vm0, %v255_v2, -inf  ;;  %vm366_vm15 = vcmp.ne.s32.totalorder %v364_v60, 0  ;;  %vm359_vm3 = vmand %vm922_vm12, %vm926_vm13  ;;  %p690_p5 = pnand %p689_p4, %p828_p9  ;;  %p695_p10 = por %p694_p8, %p693_p7 }
  0x30   : > { %v260_v5 = vrot.slane %v259_v3, 4  ;;  %v267_v6 = vrot.slane %v266_v4, 4  ;;  %vm368_vm4 = vmand %vm360_vm14, %vm366_vm15 }
  0x31   : > { %p691_p6 = pneg %p690_p5 }
  0x32   : > { %v261_v7 = vmax.f32 %v259_v3, %v260_v5  ;;  %v268_v8 = vmax.f32 %v266_v4, %v267_v6 }
  0x33   : > { %p696_p13 = pnand %p695_p10, %p691_p6 }
  0x34   : > { %v262_v9 = vrot.slane %v261_v7, 2  ;;  %v269_v10 = vrot.slane %v268_v8, 2 }
  0x36   : > { %v263_v11 = vmax.f32 %v261_v7, %v262_v9  ;;  %v270_v12 = vmax.f32 %v268_v8, %v269_v10 }
  0x38   : > { %v264_v13 = vrot.slane %v263_v11, 1  ;;  %v271_v14 = vrot.slane %v270_v12, 1 }
  0x3a   : > { %v886_v15 = vmax.f32 %v270_v12, %v271_v14  ;;  %v888_v16 = vmax.f32 %v263_v11, %v264_v13 }
  0x3c   : > { %v275_v17 = vrot.slane %v886_v15, 4 }
  0x3e   : > { %v276_v18 = vsel %vm258_vm0, %v888_v16, %v275_v17 }
  0x3f   : > { %v278_v19 = vsub.f32 %v881_v0, %v276_v18 }
  0x41   : > { %v279_v20 = vmul.f32 1.442695, %v278_v19 }
  0x43   : > { %606 = vpow2.f32 %v279_v20 }
  0x49   : > { %v607_v21 = vpop.eup %606 }
  0x4a   : > { %282 = vst [vmem:[#allocation1] ss:$2 sm:$0xff] %v607_v21 }
  0x51   : > { %v284_v25 = vld.sshfl [vmem:[#allocation1 + $0x8] sm:$0xff pattern:$0x75316420]  ;;  %v283_v26 = vld.sshfl [vmem:[#allocation1] sm:$0xff pattern:$0x75316420] }
  0x52   : > { %v294_v27 = vsel %vm258_vm0, %v284_v25, 0.0  ;;  %v287_v28 = vsel %vm258_vm0, %v283_v26, 0.0  ;;  %315 = vst [vmem:[#allocation1] sm:$0xff] %v881_v0  ;;  %vm365_vm0 = vcmp.ne.s32.totalorder %v363_v63, 0 }
  0x53   : > { %v295_v29 = vrot.slane %v294_v27, 4  ;;  %v288_v30 = vrot.slane %v287_v28, 4  ;;  %vm367_vm5 = vmand %vm359_vm3, %vm365_vm0 }
  0x55   : > { %v296_v31 = vadd.f32 %v295_v29, %v294_v27  ;;  %v289_v32 = vadd.f32 %v288_v30, %v287_v28 }
  0x57   : > { %v297_v33 = vrot.slane %v296_v31, 2  ;;  %v290_v34 = vrot.slane %v289_v32, 2 }
  0x59   : > { %v298_v35 = vadd.f32 %v297_v33, %v296_v31  ;;  %v291_v36 = vadd.f32 %v290_v34, %v289_v32  ;;  %v317_v37 = vld [vmem:[#allocation1 + $0x1] ss:$4 sm:$0xff] }
  0x5a   : > { %322 = vst [vmem:[#allocation1] sm:$0xff] %v881_v0  ;;  %v319_v50 = vsel %vm314_vm6, %v317_v37, 0.0 }
  0x5b   : > { %v299_v38 = vrot.slane %v298_v35, 1  ;;  %v292_v39 = vrot.slane %v291_v36, 1  ;;  %v320_v59 = vadd.f32 %v319_v50, %v312_v49 }
  0x5d   : > { %v300_v41 = vadd.f32 %v299_v38, %v298_v35  ;;  %v293_v42 = vadd.f32 %v292_v39, %v291_v36 }
  0x5f   : > { %608 = vlog2.f32 %v300_v41 }
  0x60   : > { %610 = vlog2.f32 %v293_v42 }
  0x61   : > { %v324_v45 = vld [vmem:[#allocation1 + $0x2] ss:$4 sm:$0xff] }
  0x62   : > { %329 = vst [vmem:[#allocation1] sm:$0xff] %v881_v0  ;;  %v326_v56 = vsel %vm321_vm8, %v324_v45, 0.0 }
  0x63   : > { %v327_v2 = vadd.f32 %v326_v56, %v320_v59 }
  0x65   : > { %v609_v54 = vpop.eup %608 }
  0x66   : > { %v611_v55 = vpop.eup %610  ;;  %v304_v0 = vmul.f32 0.6931472, %v609_v54 }
  0x67   : > { %v302_v1 = vmul.f32 0.6931472, %v611_v55 }
  0x68   : > { %v306_v8 = vadd.f32 %v304_v0, %v886_v15  ;;  %v369_v15 = vld [vmem:[%s900_s21] sm:$0x3] }
  0x69   : > { %v331_v3 = vld [vmem:[#allocation1 + $0x3] ss:$4 sm:$0xff]  ;;  %v305_v11 = vadd.f32 %v302_v1, %v888_v16 }
  0x6a   : > { %v333_v4 = vsel %vm328_vm9, %v331_v3, 0.0 }
  0x6b   : > { %v334_v7 = vadd.f32 %v333_v4, %v327_v2 }
  0x6d   : > { %v371_v9 = vperm.slane %v334_v7, 0  ;;  %v372_v10 = vperm.slane %v334_v7, 1 }
  0x6f   : > { %v376_v12 = vsub.f32 %v306_v8, %v372_v10  ;;  %v375_v13 = vsub.f32 %v305_v11, %v371_v9 }
  0x71   : > { %v378_v14 = vsel %vm368_vm4, %v376_v12, 0.0  ;;  %v377_v16 = vsel %vm367_vm5, %v375_v13, 0.0 }
  0x72   : > { %v381_v17 = vrot.slane %v378_v14, 7 }
  0x74   : > { %v382_v18 = vsel %vm309_vm2, %v377_v16, %v381_v17 }
  0x75   : > { %v384_v19 = vadd.f32 %v382_v18, %v369_v15 }
  0x77   : > { %389 = vst.msk [vmem:[%s900_s21] sm:$0x3] %vm894_vm1, %v384_v19 }
  0x78   : > { %699 = shalt.err (!%p696_p13)
}
  0x79   : > { %541 = dma.vmem_to_hbm [thread:$0]  (%p828_p9), %s405_s16, 32, %s407_s18, %s391_s20  }
  0x7a PF: > { %s418_s29 = sand.u32 1, %s738_s9   ;;  %p551_p0 = pnand %p522_p12, %p835_p11 }
  0x7b   : > { %s419_s25 = scalar_lea.sflag [#allocation4], %s418_s29 }
  0x7c   : > { %p552_p1 = pneg %p551_p0 }
  0x7e   : > { %733 = dma.done.wait (%p552_p1), %s419_s25, 32  }
  0x7f   : > { %735 = vsyncadd (%p552_p1), %s419_s25, 4294967264  ;;  %s21_s14 = sadd.s32 1, %s758_s14   ;;  %s1002_s9 = smov %s742_s10 }
  0x80   : > { %p18_p2 = scmp.ge.s32.totalorder %s21_s14, 4   ;;  %s1003_s10 = smov %s746_s11 }
  0x81   : > { %s1004_s11 = smov %s833_s23  ;;  %s1005_s12 = smov %s754_s13 }
  0x82   : > { %s1006_s13 = smov %s1008_s17  ;;  %20 = sbr.rel (!%p18_p2) target bundleno = 8 (0x8), region = 93 }
  0x87   :  { %425 = vsyncpa [#allocation3], 1 }
  0x88   :  { %427 = vsyncpa [#allocation3 + $0x1], 1 }
  0x89   :  { %428 = vsyncpa [#allocation6], 1 }
  0x8a   :  { %430 = vsyncpa [#allocation6 + $0x1], 1 }
  0x8b   :  { %431 = vsyncpa [#allocation4], 1 }
  0x8c   :  { %433 = vsyncpa [#allocation4 + $0x1], 1 }

</bundles_post_ra>
